<compile_context>
chip_gen: v7x
topology: tpu7x:2x2x1
jax: 0.10.0
libtpu: 0.0.40
codegen_flags: <defaults>
</compile_context>

<pallas_src>
import functools

import jax
import jax.numpy as jnp
from jax.experimental import pallas as pl
from jax.experimental.pallas import tpu as pltpu

NUM_ROW = 24   # row_embed table size (nn.Embedding(24, F))
NUM_COL = 80   # col_embed table size (nn.Embedding(80, F))


def _pos_embed_kernel(col_ref, row_ref, out_ref, *, H, W, F):
    # col_ref : (F, W)     = col_embed(arange(W)).T   (transpose hoisted to wrapper)
    # row_ref : (F, H)     = row_embed(arange(H)).T
    # out_ref : (2F, H*W)  lane-dense, batch-invariant embedding slab
    col_t = col_ref[...]                                    # (F, W)
    row_t = row_ref[...]                                    # (F, H)
    for h in range(H):                                      # one-time static unroll
        lo = h * W
        # channels [0, F): col_embed[w, c] -> same (F, W) tile for every row h
        out_ref[:F, lo:lo + W] = col_t
        # channels [F, 2F): row_embed[h, c] -> column h broadcast across W lanes
        out_ref[F:, lo:lo + W] = jnp.broadcast_to(row_t[:, h:h + 1], (F, W))


def position_embedding_learned(x, col_weight, row_weight):
    """x: (B, C, H, W) (only the shape is used). Returns (B, 2F, H, W)."""
    B = x.shape[0]
    H, W = int(x.shape[-2]), int(x.shape[-1])
    F = col_weight.shape[1]
    assert H <= row_weight.shape[0] and W <= col_weight.shape[0], \
        "spatial dims exceed embedding tables"

    # Output dtype follows the weights (bf16 weights -> bf16 positions).
    dtype = jnp.result_type(col_weight.dtype, row_weight.dtype)
    HW = H * W
    itemsize = jnp.dtype(dtype).itemsize

    # Embedding "lookup" of arange(W)/arange(H) is a contiguous slice; transpose
    # once here (tiny tables) so the kernel never needs an XLU transpose.
    col_t = jnp.transpose(col_weight[:W].astype(dtype))     # (F, W)
    row_t = jnp.transpose(row_weight[:H].astype(dtype))     # (F, H)

    kernel = functools.partial(_pos_embed_kernel, H=H, W=W, F=F)

    slab = pl.pallas_call(
        kernel,
        # Single batch-invariant slab; no batch grid axis, no grid at all.
        out_shape=jax.ShapeDtypeStruct((2 * F, HW), dtype),
        in_specs=[
            pl.BlockSpec(memory_space=pltpu.MemorySpace.VMEM),   # col_embed.T
            pl.BlockSpec(memory_space=pltpu.MemorySpace.VMEM),   # row_embed.T
        ],
        out_specs=pl.BlockSpec(memory_space=pltpu.MemorySpace.VMEM),
        compiler_params=pltpu.CompilerParams(
            # Explicit headroom: covers F up to ~512 even under v5e's 16 MiB
            # default scoped-VMEM limit; well under v7x's 64 MiB physical.
            vmem_limit_bytes=32 * 1024 * 1024),
        cost_estimate=pl.CostEstimate(
            flops=0, transcendentals=0,
            bytes_accessed=(2 * F * HW + F * (H + W)) * itemsize),
    )(col_t, row_t)

    # Free contiguous reshape back to (2F, H, W); batch copies are only ever
    # materialized if the consumer forces the broadcast.
    pos = slab.reshape(2 * F, H, W)
    return jnp.broadcast_to(pos[None], (B, 2 * F, H, W))


def reference(x, col_weight, row_weight):
    """Pure-JAX reference matching the PyTorch forward exactly."""
    B = x.shape[0]
    H, W = x.shape[-2], x.shape[-1]
    x_emb = col_weight[:W]                                   # (W, F)
    y_emb = row_weight[:H]                                   # (H, F)
    pos = jnp.concatenate(
        [jnp.broadcast_to(x_emb[None, :, :], (H, W, x_emb.shape[-1])),
         jnp.broadcast_to(y_emb[:, None, :], (H, W, y_emb.shape[-1]))],
        axis=-1)                                             # (H, W, 2F)
    pos = jnp.transpose(pos, (2, 0, 1))[None]                # (1, 2F, H, W)
    return jnp.broadcast_to(pos, (B,) + pos.shape[1:])


if __name__ == "__main__":
    key = jax.random.PRNGKey(0)
    k_row, k_col, k_x = jax.random.split(key, 3)

    num_pos_feats = 32  # small synthetic size (module default is 256)
    # nn.init.uniform_ -> U[0, 1)
    row_weight = jax.random.uniform(k_row, (NUM_ROW, num_pos_feats), jnp.float32)
    col_weight = jax.random.uniform(k_col, (NUM_COL, num_pos_feats), jnp.float32)

    # Example input (NCHW); only the shape matters for this module.
    x = jax.random.normal(k_x, (2, 4, 16, 16), jnp.float32)

    pos = position_embedding_learned(x, col_weight, row_weight)
    pos = jax.block_until_ready(pos)

    ref = reference(x, col_weight, row_weight)
    assert pos.shape == (2, 2 * num_pos_feats, 16, 16), pos.shape
    assert pos.dtype == col_weight.dtype, pos.dtype
    assert jnp.allclose(pos, ref), "mismatch vs reference"

    print("KERNEL_OK")
</pallas_src>

<mosaic_0001>
module attributes {stable_mosaic.version = 11 : i64} {
  func.func @_pos_embed_kernel(%arg0: memref<32x16xf32, #tpu.memory_space<vmem>>, %arg1: memref<32x16xf32, #tpu.memory_space<vmem>>, %arg2: memref<64x256xf32, #tpu.memory_space<vmem>>) attributes {dimension_semantics = [], scalar_prefetch = 0 : i64, scratch_operands = 0 : i64, tpu.core_type = #tpu.core_type<tc>} {
    %c0 = arith.constant 0 : index
    %c0_0 = arith.constant 0 : index
    %0 = vector.load %arg0[%c0, %c0_0] : memref<32x16xf32, #tpu.memory_space<vmem>>, vector<32x16xf32>
    %c0_1 = arith.constant 0 : index
    %c0_2 = arith.constant 0 : index
    %1 = vector.load %arg1[%c0_1, %c0_2] : memref<32x16xf32, #tpu.memory_space<vmem>>, vector<32x16xf32>
    %c0_3 = arith.constant 0 : index
    %c0_4 = arith.constant 0 : index
    %2 = vector.load %arg2[%c0_3, %c0_4] : memref<64x256xf32, #tpu.memory_space<vmem>>, vector<32x16xf32>
    tpu.vector_store %arg2[%c0_3, %c0_4], %0 {strides = array<i32>} : memref<64x256xf32, #tpu.memory_space<vmem>>, vector<32x16xf32>,
    %3 = vector.extract_strided_slice %1 {offsets = [0, 0], sizes = [32, 1], strides = [1, 1]} : vector<32x16xf32> to vector<32x1xf32>
    %4 = vector.shape_cast %3 : vector<32x1xf32> to vector<32x1xf32>
    %5 = vector.broadcast %4 : vector<32x1xf32> to vector<32x16xf32>
    %c32 = arith.constant 32 : index
    %c0_5 = arith.constant 0 : index
    %6 = vector.load %arg2[%c32, %c0_5] : memref<64x256xf32, #tpu.memory_space<vmem>>, vector<32x16xf32>
    tpu.vector_store %arg2[%c32, %c0_5], %5 {strides = array<i32>} : memref<64x256xf32, #tpu.memory_space<vmem>>, vector<32x16xf32>,
    %c0_6 = arith.constant 0 : index
    %c16 = arith.constant 16 : index
    %7 = vector.load %arg2[%c0_6, %c16] : memref<64x256xf32, #tpu.memory_space<vmem>>, vector<32x16xf32>
    tpu.vector_store %arg2[%c0_6, %c16], %0 {strides = array<i32>} : memref<64x256xf32, #tpu.memory_space<vmem>>, vector<32x16xf32>,
    %8 = vector.extract_strided_slice %1 {offsets = [0, 1], sizes = [32, 1], strides = [1, 1]} : vector<32x16xf32> to vector<32x1xf32>
    %9 = vector.shape_cast %8 : vector<32x1xf32> to vector<32x1xf32>
    %10 = vector.broadcast %9 : vector<32x1xf32> to vector<32x16xf32>
    %c32_7 = arith.constant 32 : index
    %c16_8 = arith.constant 16 : index
    %11 = vector.load %arg2[%c32_7, %c16_8] : memref<64x256xf32, #tpu.memory_space<vmem>>, vector<32x16xf32>
    tpu.vector_store %arg2[%c32_7, %c16_8], %10 {strides = array<i32>} : memref<64x256xf32, #tpu.memory_space<vmem>>, vector<32x16xf32>,
    %c0_9 = arith.constant 0 : index
    %c32_10 = arith.constant 32 : index
    %12 = vector.load %arg2[%c0_9, %c32_10] : memref<64x256xf32, #tpu.memory_space<vmem>>, vector<32x16xf32>
    tpu.vector_store %arg2[%c0_9, %c32_10], %0 {strides = array<i32>} : memref<64x256xf32, #tpu.memory_space<vmem>>, vector<32x16xf32>,
    %13 = vector.extract_strided_slice %1 {offsets = [0, 2], sizes = [32, 1], strides = [1, 1]} : vector<32x16xf32> to vector<32x1xf32>
    %14 = vector.shape_cast %13 : vector<32x1xf32> to vector<32x1xf32>
    %15 = vector.broadcast %14 : vector<32x1xf32> to vector<32x16xf32>
    %c32_11 = arith.constant 32 : index
    %c32_12 = arith.constant 32 : index
    %16 = vector.load %arg2[%c32_11, %c32_12] : memref<64x256xf32, #tpu.memory_space<vmem>>, vector<32x16xf32>
    tpu.vector_store %arg2[%c32_11, %c32_12], %15 {strides = array<i32>} : memref<64x256xf32, #tpu.memory_space<vmem>>, vector<32x16xf32>,
    %c0_13 = arith.constant 0 : index
    %c48 = arith.constant 48 : index
    %17 = vector.load %arg2[%c0_13, %c48] : memref<64x256xf32, #tpu.memory_space<vmem>>, vector<32x16xf32>
    tpu.vector_store %arg2[%c0_13, %c48], %0 {strides = array<i32>} : memref<64x256xf32, #tpu.memory_space<vmem>>, vector<32x16xf32>,
    %18 = vector.extract_strided_slice %1 {offsets = [0, 3], sizes = [32, 1], strides = [1, 1]} : vector<32x16xf32> to vector<32x1xf32>
    %19 = vector.shape_cast %18 : vector<32x1xf32> to vector<32x1xf32>
    %20 = vector.broadcast %19 : vector<32x1xf32> to vector<32x16xf32>
    %c32_14 = arith.constant 32 : index
    %c48_15 = arith.constant 48 : index
    %21 = vector.load %arg2[%c32_14, %c48_15] : memref<64x256xf32, #tpu.memory_space<vmem>>, vector<32x16xf32>
    tpu.vector_store %arg2[%c32_14, %c48_15], %20 {strides = array<i32>} : memref<64x256xf32, #tpu.memory_space<vmem>>, vector<32x16xf32>,
    %c0_16 = arith.constant 0 : index
    %c64 = arith.constant 64 : index
    %22 = vector.load %arg2[%c0_16, %c64] : memref<64x256xf32, #tpu.memory_space<vmem>>, vector<32x16xf32>
    tpu.vector_store %arg2[%c0_16, %c64], %0 {strides = array<i32>} : memref<64x256xf32, #tpu.memory_space<vmem>>, vector<32x16xf32>,
    %23 = vector.extract_strided_slice %1 {offsets = [0, 4], sizes = [32, 1], strides = [1, 1]} : vector<32x16xf32> to vector<32x1xf32>
    %24 = vector.shape_cast %23 : vector<32x1xf32> to vector<32x1xf32>
    %25 = vector.broadcast %24 : vector<32x1xf32> to vector<32x16xf32>
    %c32_17 = arith.constant 32 : index
    %c64_18 = arith.constant 64 : index
    %26 = vector.load %arg2[%c32_17, %c64_18] : memref<64x256xf32, #tpu.memory_space<vmem>>, vector<32x16xf32>
    tpu.vector_store %arg2[%c32_17, %c64_18], %25 {strides = array<i32>} : memref<64x256xf32, #tpu.memory_space<vmem>>, vector<32x16xf32>,
    %c0_19 = arith.constant 0 : index
    %c80 = arith.constant 80 : index
    %27 = vector.load %arg2[%c0_19, %c80] : memref<64x256xf32, #tpu.memory_space<vmem>>, vector<32x16xf32>
    tpu.vector_store %arg2[%c0_19, %c80], %0 {strides = array<i32>} : memref<64x256xf32, #tpu.memory_space<vmem>>, vector<32x16xf32>,
    %28 = vector.extract_strided_slice %1 {offsets = [0, 5], sizes = [32, 1], strides = [1, 1]} : vector<32x16xf32> to vector<32x1xf32>
    %29 = vector.shape_cast %28 : vector<32x1xf32> to vector<32x1xf32>
    %30 = vector.broadcast %29 : vector<32x1xf32> to vector<32x16xf32>
    %c32_20 = arith.constant 32 : index
    %c80_21 = arith.constant 80 : index
    %31 = vector.load %arg2[%c32_20, %c80_21] : memref<64x256xf32, #tpu.memory_space<vmem>>, vector<32x16xf32>
    tpu.vector_store %arg2[%c32_20, %c80_21], %30 {strides = array<i32>} : memref<64x256xf32, #tpu.memory_space<vmem>>, vector<32x16xf32>,
    %c0_22 = arith.constant 0 : index
    %c96 = arith.constant 96 : index
    %32 = vector.load %arg2[%c0_22, %c96] : memref<64x256xf32, #tpu.memory_space<vmem>>, vector<32x16xf32>
    tpu.vector_store %arg2[%c0_22, %c96], %0 {strides = array<i32>} : memref<64x256xf32, #tpu.memory_space<vmem>>, vector<32x16xf32>,
    %33 = vector.extract_strided_slice %1 {offsets = [0, 6], sizes = [32, 1], strides = [1, 1]} : vector<32x16xf32> to vector<32x1xf32>
    %34 = vector.shape_cast %33 : vector<32x1xf32> to vector<32x1xf32>
    %35 = vector.broadcast %34 : vector<32x1xf32> to vector<32x16xf32>
    %c32_23 = arith.constant 32 : index
    %c96_24 = arith.constant 96 : index
    %36 = vector.load %arg2[%c32_23, %c96_24] : memref<64x256xf32, #tpu.memory_space<vmem>>, vector<32x16xf32>
    tpu.vector_store %arg2[%c32_23, %c96_24], %35 {strides = array<i32>} : memref<64x256xf32, #tpu.memory_space<vmem>>, vector<32x16xf32>,
    %c0_25 = arith.constant 0 : index
    %c112 = arith.constant 112 : index
    %37 = vector.load %arg2[%c0_25, %c112] : memref<64x256xf32, #tpu.memory_space<vmem>>, vector<32x16xf32>
    tpu.vector_store %arg2[%c0_25, %c112], %0 {strides = array<i32>} : memref<64x256xf32, #tpu.memory_space<vmem>>, vector<32x16xf32>,
    %38 = vector.extract_strided_slice %1 {offsets = [0, 7], sizes = [32, 1], strides = [1, 1]} : vector<32x16xf32> to vector<32x1xf32>
    %39 = vector.shape_cast %38 : vector<32x1xf32> to vector<32x1xf32>
    %40 = vector.broadcast %39 : vector<32x1xf32> to vector<32x16xf32>
    %c32_26 = arith.constant 32 : index
    %c112_27 = arith.constant 112 : index
    %41 = vector.load %arg2[%c32_26, %c112_27] : memref<64x256xf32, #tpu.memory_space<vmem>>, vector<32x16xf32>
    tpu.vector_store %arg2[%c32_26, %c112_27], %40 {strides = array<i32>} : memref<64x256xf32, #tpu.memory_space<vmem>>, vector<32x16xf32>,
    %c0_28 = arith.constant 0 : index
    %c128 = arith.constant 128 : index
    %42 = vector.load %arg2[%c0_28, %c128] : memref<64x256xf32, #tpu.memory_space<vmem>>, vector<32x16xf32>
    tpu.vector_store %arg2[%c0_28, %c128], %0 {strides = array<i32>} : memref<64x256xf32, #tpu.memory_space<vmem>>, vector<32x16xf32>,
    %43 = vector.extract_strided_slice %1 {offsets = [0, 8], sizes = [32, 1], strides = [1, 1]} : vector<32x16xf32> to vector<32x1xf32>
    %44 = vector.shape_cast %43 : vector<32x1xf32> to vector<32x1xf32>
    %45 = vector.broadcast %44 : vector<32x1xf32> to vector<32x16xf32>
    %c32_29 = arith.constant 32 : index
    %c128_30 = arith.constant 128 : index
    %46 = vector.load %arg2[%c32_29, %c128_30] : memref<64x256xf32, #tpu.memory_space<vmem>>, vector<32x16xf32>
    tpu.vector_store %arg2[%c32_29, %c128_30], %45 {strides = array<i32>} : memref<64x256xf32, #tpu.memory_space<vmem>>, vector<32x16xf32>,
    %c0_31 = arith.constant 0 : index
    %c144 = arith.constant 144 : index
    %47 = vector.load %arg2[%c0_31, %c144] : memref<64x256xf32, #tpu.memory_space<vmem>>, vector<32x16xf32>
    tpu.vector_store %arg2[%c0_31, %c144], %0 {strides = array<i32>} : memref<64x256xf32, #tpu.memory_space<vmem>>, vector<32x16xf32>,
    %48 = vector.extract_strided_slice %1 {offsets = [0, 9], sizes = [32, 1], strides = [1, 1]} : vector<32x16xf32> to vector<32x1xf32>
    %49 = vector.shape_cast %48 : vector<32x1xf32> to vector<32x1xf32>
    %50 = vector.broadcast %49 : vector<32x1xf32> to vector<32x16xf32>
    %c32_32 = arith.constant 32 : index
    %c144_33 = arith.constant 144 : index
    %51 = vector.load %arg2[%c32_32, %c144_33] : memref<64x256xf32, #tpu.memory_space<vmem>>, vector<32x16xf32>
    tpu.vector_store %arg2[%c32_32, %c144_33], %50 {strides = array<i32>} : memref<64x256xf32, #tpu.memory_space<vmem>>, vector<32x16xf32>,
    %c0_34 = arith.constant 0 : index
    %c160 = arith.constant 160 : index
    %52 = vector.load %arg2[%c0_34, %c160] : memref<64x256xf32, #tpu.memory_space<vmem>>, vector<32x16xf32>
    tpu.vector_store %arg2[%c0_34, %c160], %0 {strides = array<i32>} : memref<64x256xf32, #tpu.memory_space<vmem>>, vector<32x16xf32>,
    %53 = vector.extract_strided_slice %1 {offsets = [0, 10], sizes = [32, 1], strides = [1, 1]} : vector<32x16xf32> to vector<32x1xf32>
    %54 = vector.shape_cast %53 : vector<32x1xf32> to vector<32x1xf32>
    %55 = vector.broadcast %54 : vector<32x1xf32> to vector<32x16xf32>
    %c32_35 = arith.constant 32 : index
    %c160_36 = arith.constant 160 : index
    %56 = vector.load %arg2[%c32_35, %c160_36] : memref<64x256xf32, #tpu.memory_space<vmem>>, vector<32x16xf32>
    tpu.vector_store %arg2[%c32_35, %c160_36], %55 {strides = array<i32>} : memref<64x256xf32, #tpu.memory_space<vmem>>, vector<32x16xf32>,
    %c0_37 = arith.constant 0 : index
    %c176 = arith.constant 176 : index
    %57 = vector.load %arg2[%c0_37, %c176] : memref<64x256xf32, #tpu.memory_space<vmem>>, vector<32x16xf32>
    tpu.vector_store %arg2[%c0_37, %c176], %0 {strides = array<i32>} : memref<64x256xf32, #tpu.memory_space<vmem>>, vector<32x16xf32>,
    %58 = vector.extract_strided_slice %1 {offsets = [0, 11], sizes = [32, 1], strides = [1, 1]} : vector<32x16xf32> to vector<32x1xf32>
    %59 = vector.shape_cast %58 : vector<32x1xf32> to vector<32x1xf32>
    %60 = vector.broadcast %59 : vector<32x1xf32> to vector<32x16xf32>
    %c32_38 = arith.constant 32 : index
    %c176_39 = arith.constant 176 : index
    %61 = vector.load %arg2[%c32_38, %c176_39] : memref<64x256xf32, #tpu.memory_space<vmem>>, vector<32x16xf32>
    tpu.vector_store %arg2[%c32_38, %c176_39], %60 {strides = array<i32>} : memref<64x256xf32, #tpu.memory_space<vmem>>, vector<32x16xf32>,
    %c0_40 = arith.constant 0 : index
    %c192 = arith.constant 192 : index
    %62 = vector.load %arg2[%c0_40, %c192] : memref<64x256xf32, #tpu.memory_space<vmem>>, vector<32x16xf32>
    tpu.vector_store %arg2[%c0_40, %c192], %0 {strides = array<i32>} : memref<64x256xf32, #tpu.memory_space<vmem>>, vector<32x16xf32>,
    %63 = vector.extract_strided_slice %1 {offsets = [0, 12], sizes = [32, 1], strides = [1, 1]} : vector<32x16xf32> to vector<32x1xf32>
    %64 = vector.shape_cast %63 : vector<32x1xf32> to vector<32x1xf32>
    %65 = vector.broadcast %64 : vector<32x1xf32> to vector<32x16xf32>
    %c32_41 = arith.constant 32 : index
    %c192_42 = arith.constant 192 : index
    %66 = vector.load %arg2[%c32_41, %c192_42] : memref<64x256xf32, #tpu.memory_space<vmem>>, vector<32x16xf32>
    tpu.vector_store %arg2[%c32_41, %c192_42], %65 {strides = array<i32>} : memref<64x256xf32, #tpu.memory_space<vmem>>, vector<32x16xf32>,
    %c0_43 = arith.constant 0 : index
    %c208 = arith.constant 208 : index
    %67 = vector.load %arg2[%c0_43, %c208] : memref<64x256xf32, #tpu.memory_space<vmem>>, vector<32x16xf32>
    tpu.vector_store %arg2[%c0_43, %c208], %0 {strides = array<i32>} : memref<64x256xf32, #tpu.memory_space<vmem>>, vector<32x16xf32>,
    %68 = vector.extract_strided_slice %1 {offsets = [0, 13], sizes = [32, 1], strides = [1, 1]} : vector<32x16xf32> to vector<32x1xf32>
    %69 = vector.shape_cast %68 : vector<32x1xf32> to vector<32x1xf32>
    %70 = vector.broadcast %69 : vector<32x1xf32> to vector<32x16xf32>
    %c32_44 = arith.constant 32 : index
    %c208_45 = arith.constant 208 : index
    %71 = vector.load %arg2[%c32_44, %c208_45] : memref<64x256xf32, #tpu.memory_space<vmem>>, vector<32x16xf32>
    tpu.vector_store %arg2[%c32_44, %c208_45], %70 {strides = array<i32>} : memref<64x256xf32, #tpu.memory_space<vmem>>, vector<32x16xf32>,
    %c0_46 = arith.constant 0 : index
    %c224 = arith.constant 224 : index
    %72 = vector.load %arg2[%c0_46, %c224] : memref<64x256xf32, #tpu.memory_space<vmem>>, vector<32x16xf32>
    tpu.vector_store %arg2[%c0_46, %c224], %0 {strides = array<i32>} : memref<64x256xf32, #tpu.memory_space<vmem>>, vector<32x16xf32>,
    %73 = vector.extract_strided_slice %1 {offsets = [0, 14], sizes = [32, 1], strides = [1, 1]} : vector<32x16xf32> to vector<32x1xf32>
    %74 = vector.shape_cast %73 : vector<32x1xf32> to vector<32x1xf32>
    %75 = vector.broadcast %74 : vector<32x1xf32> to vector<32x16xf32>
    %c32_47 = arith.constant 32 : index
    %c224_48 = arith.constant 224 : index
    %76 = vector.load %arg2[%c32_47, %c224_48] : memref<64x256xf32, #tpu.memory_space<vmem>>, vector<32x16xf32>
    tpu.vector_store %arg2[%c32_47, %c224_48], %75 {strides = array<i32>} : memref<64x256xf32, #tpu.memory_space<vmem>>, vector<32x16xf32>,
    %c0_49 = arith.constant 0 : index
    %c240 = arith.constant 240 : index
    %77 = vector.load %arg2[%c0_49, %c240] : memref<64x256xf32, #tpu.memory_space<vmem>>, vector<32x16xf32>
    tpu.vector_store %arg2[%c0_49, %c240], %0 {strides = array<i32>} : memref<64x256xf32, #tpu.memory_space<vmem>>, vector<32x16xf32>,
    %78 = vector.extract_strided_slice %1 {offsets = [0, 15], sizes = [32, 1], strides = [1, 1]} : vector<32x16xf32> to vector<32x1xf32>
    %79 = vector.shape_cast %78 : vector<32x1xf32> to vector<32x1xf32>
    %80 = vector.broadcast %79 : vector<32x1xf32> to vector<32x16xf32>
    %c32_50 = arith.constant 32 : index
    %c240_51 = arith.constant 240 : index
    %81 = vector.load %arg2[%c32_50, %c240_51] : memref<64x256xf32, #tpu.memory_space<vmem>>, vector<32x16xf32>
    tpu.vector_store %arg2[%c32_50, %c240_51], %80 {strides = array<i32>} : memref<64x256xf32, #tpu.memory_space<vmem>>, vector<32x16xf32>,
    return
  }
}

</mosaic_0001>

<bundles_post_ra>
// kernel: tpu_custom_call.1
= control target key start
LH: loop header
LB: loop body
LE: loop exit
PB: predicated region body
PF: predicated region fallthrough
CT: control target
= control target key end

     0   :  { %v601_v1 = vmov 0   ;;  %vm20_vm0 = vcmask 130048   ;;  %s936_s0 = inlined_call_operand.vmem [shape: f32[32,16], index: 0, kind: input, shape index: {}]   ;;  %s937_s1 = inlined_call_operand.vmem [shape: f32[32,16], index: 1, kind: input, shape index: {}]   ;;  %s938_s2 = inlined_call_operand.hbm [shape: f32[64,256], index: 2, kind: output, shape index: {}]  }
   0x1   :  { %v644_v0 = vld [vmem:[%s937_s1 + $0x10] sm:$0xff]  ;;  %546 = vset.pattern.permute.xlu1 %v601_v1  ;;  %545 = vset.pattern.permute.xlu0 %v601_v1  ;;  %v649_v2 = vld [vmem:[%s937_s1] sm:$0xff]  ;;  %v655_v3 = vld [vmem:[%s937_s1 + $0x18] sm:$0xff] }
   0x2   :  { %37 = vperm.xlu1 %546, %v644_v0   ;;  %v660_v4 = vld [vmem:[%s936_s0 + $0x8] sm:$0xff]  ;;  %27 = vperm.xlu0 %545, %v649_v2   ;;  %v666_v5 = vld [vmem:[%s936_s0 + $0x18] sm:$0xff]  ;;  %v676_v7 = vld [vmem:[%s936_s0] sm:$0xff] }
   0x3   :  { %v671_v6 = vld [vmem:[%s937_s1 + $0x8] sm:$0xff]  ;;  %v681_v8 = vld [vmem:[%s936_s0 + $0x10] sm:$0xff]  ;;  %21 = vst.msk [vmem:[#allocation2] sm:$0xff] %vm20_vm0, %v676_v7  ;;  %22 = vst.msk [vmem:[#allocation2 + $0x10] sm:$0xff] %vm20_vm0, %v660_v4 }
   0x4   :  { %23 = vst.msk [vmem:[#allocation2 + $0x20] sm:$0xff] %vm20_vm0, %v681_v8  ;;  %24 = vst.msk [vmem:[#allocation2 + $0x30] sm:$0xff] %vm20_vm0, %v666_v5 }
   0x5   :  { %312 = vst.msk [vmem:[#allocation2 + $0x8] sm:$0xff] %vm20_vm0, %v676_v7  ;;  %313 = vst.msk [vmem:[#allocation2 + $0x18] sm:$0xff] %vm20_vm0, %v660_v4 }
   0x6   :  { %314 = vst.msk [vmem:[#allocation2 + $0x28] sm:$0xff] %vm20_vm0, %v681_v8  ;;  %315 = vst.msk [vmem:[#allocation2 + $0x38] sm:$0xff] %vm20_vm0, %v666_v5 }
   0x7   :  { %7 = vsyncpa [#allocation3], 0  ;;  %42 = vperm.xlu1 %546, %v655_v3   ;;  %32 = vperm.xlu0 %545, %v671_v6   ;;  %s602_s0 = smov 16   ;;  %v603_v9 = vmov 1   ;;  %s604_s1 = smov 32   ;;  %v605_v10 = vmov 2  }
   0x8   :  { %s606_s25 = smov 48   ;;  %v607_v11 = vmov 3   ;;  %s608_s26 = smov 64   ;;  %v609_v12 = vmov 4   ;;  %v611_v13 = vmov 5   ;;  %v613_v14 = vmov 6  }
   0x9   :  { %s610_s27 = smov 80   ;;  %s612_s28 = smov 96   ;;  %v615_v15 = vmov 7   ;;  %v616_v16 = vmov 8   ;;  %v617_v17 = vmov 9   ;;  %v618_v18 = vmov 10  }
   0xa   :  { %s614_s29 = smov 112   ;;  %v619_v21 = vmov 11   ;;  %vm65_vm1 = vcmask 261248   ;;  %v620_v26 = vmov 12   ;;  %v621_v29 = vmov 13   ;;  %s624_s30 = smov [#allocation2]  }
   0xb   :  { %55 = vrot.lane.b32.xlu1 %v660_v4, %s602_s0  ;;  %53 = vrot.lane.b32.xlu0 %v676_v7, %s602_s0  ;;  %vm102_vm2 = vcmask 392448   ;;  %v622_v34 = vmov 14   ;;  %v623_v39 = vmov 15   ;;  %vm139_vm3 = vcmask 523648   ;;  %s509_s3 = sshll.u32 %s624_s30, 4  ;;  %s510_s3 = int_to_ptr.vmem [resolvable:$true] %s509_s3 }
   0xc   :  { %548 = vset.pattern.permute.xlu1 %v603_v9  ;;  %547 = vset.pattern.permute.xlu0 %v603_v9  ;;  %vm176_vm4 = vcmask 654848   ;;  %vm213_vm5 = vcmask 786048   ;;  %vm250_vm6 = vcmask 917248   ;;  %vm287_vm7 = vcmask 1048448   ;;  %s577_s4 = scalar_lea.vmem %s510_s3, 2048  ;;  %p582_p1 = scmp.lt.s32.totalorder %s510_s3, %s510_s3 }
   0xd   :  { %p578_p0 = scmp.ne.s32.totalorder %s510_s3, %s577_s4  ;;  %p583_p2 = scmp.lt.s32.totalorder %s577_s4, %s577_s4 }
   0xf   :  { %59 = vrot.lane.b32.xlu1 %v666_v5, %s602_s0  ;;  %57 = vrot.lane.b32.xlu0 %v681_v8, %s602_s0  ;;  %p584_p3 = por %p583_p2, %p582_p1 }
  0x11   :  { %p585_p4 = pnand %p584_p3, %p578_p0 }
  0x13   :  { %75 = vperm.xlu1 %548, %v671_v6   ;;  %71 = vperm.xlu0 %547, %v649_v2  }
  0x17   :  { %79 = vperm.xlu1 %548, %v644_v0   ;;  %83 = vperm.xlu0 %547, %v655_v3  }
  0x1b   :  { %90 = vrot.lane.b32.xlu1 %v676_v7, %s604_s1  ;;  %92 = vrot.lane.b32.xlu0 %v660_v4, %s604_s1 }
  0x1c   :  { %549 = vset.pattern.permute.xlu1 %v605_v10  ;;  %550 = vset.pattern.permute.xlu0 %v605_v10 }
  0x1f   :  { %94 = vrot.lane.b32.xlu1 %v681_v8, %s604_s1  ;;  %96 = vrot.lane.b32.xlu0 %v666_v5, %s604_s1 }
  0x23   :  { %108 = vperm.xlu1 %549, %v649_v2   ;;  %112 = vperm.xlu0 %550, %v671_v6  }
  0x27   :  { %116 = vperm.xlu1 %549, %v644_v0   ;;  %127 = vrot.lane.b32.xlu0 %v676_v7, %s606_s25 }
  0x28   :  { %551 = vset.pattern.permute.xlu0 %v607_v11 }
  0x2b   :  { %120 = vperm.xlu1 %549, %v655_v3   ;;  %131 = vrot.lane.b32.xlu0 %v681_v8, %s606_s25 }
  0x2f   :  { %129 = vrot.lane.b32.xlu1 %v660_v4, %s606_s25  ;;  %145 = vperm.xlu0 %551, %v649_v2  }
  0x30   :  { %552 = vset.pattern.permute.xlu1 %v607_v11 }
  0x33   :  { %133 = vrot.lane.b32.xlu1 %v666_v5, %s606_s25  ;;  %157 = vperm.xlu0 %551, %v655_v3  }
  0x37   :  { %149 = vperm.xlu1 %552, %v671_v6   ;;  %166 = vrot.lane.b32.xlu0 %v660_v4, %s608_s26 }
  0x38   :  { %554 = vset.pattern.permute.xlu0 %v609_v12 }
  0x3b   :  { %153 = vperm.xlu1 %552, %v644_v0   ;;  %170 = vrot.lane.b32.xlu0 %v666_v5, %s608_s26 }
  0x3f   :  { %164 = vrot.lane.b32.xlu1 %v676_v7, %s608_s26  ;;  %186 = vperm.xlu0 %554, %v671_v6  }
  0x40   :  { %553 = vset.pattern.permute.xlu1 %v609_v12 }
  0x43   :  { %168 = vrot.lane.b32.xlu1 %v681_v8, %s608_s26  ;;  %201 = vrot.lane.b32.xlu0 %v676_v7, %s610_s27 }
  0x44   :  { %555 = vset.pattern.permute.xlu0 %v611_v13 }
  0x47   :  { %182 = vperm.xlu1 %553, %v649_v2   ;;  %205 = vrot.lane.b32.xlu0 %v681_v8, %s610_s27 }
  0x4b   :  { %190 = vperm.xlu1 %553, %v644_v0   ;;  %219 = vperm.xlu0 %555, %v649_v2  }
  0x4f   :  { %194 = vperm.xlu1 %553, %v655_v3   ;;  %231 = vperm.xlu0 %555, %v655_v3  }
  0x53   :  { %203 = vrot.lane.b32.xlu1 %v660_v4, %s610_s27  ;;  %240 = vrot.lane.b32.xlu0 %v660_v4, %s612_s28 }
  0x54   :  { %556 = vset.pattern.permute.xlu1 %v611_v13  ;;  %558 = vset.pattern.permute.xlu0 %v613_v14 }
  0x57   :  { %207 = vrot.lane.b32.xlu1 %v666_v5, %s610_s27  ;;  %244 = vrot.lane.b32.xlu0 %v666_v5, %s612_s28 }
  0x5b   :  { %223 = vperm.xlu1 %556, %v671_v6   ;;  %260 = vperm.xlu0 %558, %v671_v6  }
  0x5f   :  { %227 = vperm.xlu1 %556, %v644_v0   ;;  %275 = vrot.lane.b32.xlu0 %v676_v7, %s614_s29 }
  0x60   :  { %559 = vset.pattern.permute.xlu0 %v615_v15 }
  0x63   :  { %238 = vrot.lane.b32.xlu1 %v676_v7, %s612_s28  ;;  %279 = vrot.lane.b32.xlu0 %v681_v8, %s614_s29 }
  0x64   :  { %557 = vset.pattern.permute.xlu1 %v613_v14 }
  0x67   :  { %242 = vrot.lane.b32.xlu1 %v681_v8, %s612_s28  ;;  %293 = vperm.xlu0 %559, %v649_v2  }
  0x6b   :  { %256 = vperm.xlu1 %557, %v649_v2   ;;  %305 = vperm.xlu0 %559, %v655_v3  }
  0x6f   :  { %264 = vperm.xlu1 %557, %v644_v0   ;;  %562 = vset.pattern.permute.xlu0 %v616_v16 }
  0x70   :  { %321 = vperm.xlu0 %562, %v671_v6  }
  0x73   :  { %268 = vperm.xlu1 %557, %v655_v3  }
  0x74   :  { %563 = vset.pattern.permute.xlu0 %v617_v17 }
  0x75   :  { %341 = vperm.xlu0 %563, %v649_v2  }
  0x77   :  { %277 = vrot.lane.b32.xlu1 %v660_v4, %s614_s29 }
  0x78   :  { %560 = vset.pattern.permute.xlu1 %v615_v15 }
  0x79   :  { %353 = vperm.xlu0 %563, %v655_v3  }
  0x7b   :  { %281 = vrot.lane.b32.xlu1 %v666_v5, %s614_s29 }
  0x7d   :  { %566 = vset.pattern.permute.xlu0 %v618_v18 }
  0x7e   :  { %369 = vperm.xlu0 %566, %v671_v6  }
  0x7f   :  { %297 = vperm.xlu1 %560, %v671_v6  }
  0x81   :  { %v38_v19 = vpop.permute.xlu1 %37  ;;  %v28_v20 = vpop.permute.xlu0 %27 }
  0x82   :  { %567 = vset.pattern.permute.xlu0 %v619_v21  ;;  %47 = vst.msk [vmem:[#allocation2 + $0x60] sm:$0xff] %vm20_vm0, %v38_v19  ;;  %45 = vst.msk [vmem:[#allocation2 + $0x40] sm:$0xff] %vm20_vm0, %v28_v20 }
  0x83   :  { %301 = vperm.xlu1 %560, %v644_v0   ;;  %389 = vperm.xlu0 %567, %v649_v2  }
  0x86   :  { %v43_v22 = vpop.permute.xlu1 %42  ;;  %v33_v23 = vpop.permute.xlu0 %32 }
  0x87   :  { %48 = vst.msk [vmem:[#allocation2 + $0x70] sm:$0xff] %vm20_vm0, %v43_v22  ;;  %561 = vset.pattern.permute.xlu1 %v616_v16  ;;  %46 = vst.msk [vmem:[#allocation2 + $0x50] sm:$0xff] %vm20_vm0, %v33_v23  ;;  %401 = vperm.xlu0 %567, %v655_v3  }
  0x88   :  { %317 = vperm.xlu1 %561, %v649_v2  }
  0x8a   :  { %v56_v24 = vpop.permute.xlu1 %55  ;;  %v54_v25 = vpop.permute.xlu0 %53 }
  0x8b   :  { %67 = vst.msk [vmem:[#allocation2 + $0x10] sm:$0xff] %vm65_vm1, %v56_v24  ;;  %337 = vst.msk [vmem:[#allocation2 + $0x18] sm:$0xff] %vm65_vm1, %v56_v24  ;;  %570 = vset.pattern.permute.xlu0 %v620_v26 }
  0x8c   :  { %66 = vst.msk [vmem:[#allocation2] sm:$0xff] %vm65_vm1, %v54_v25  ;;  %336 = vst.msk [vmem:[#allocation2 + $0x8] sm:$0xff] %vm65_vm1, %v54_v25  ;;  %325 = vperm.xlu1 %561, %v644_v0   ;;  %417 = vperm.xlu0 %570, %v671_v6  }
  0x8e   :  { %v60_v27 = vpop.permute.xlu1 %59  ;;  %v58_v28 = vpop.permute.xlu0 %57 }
  0x8f   :  { %69 = vst.msk [vmem:[#allocation2 + $0x30] sm:$0xff] %vm65_vm1, %v60_v27  ;;  %339 = vst.msk [vmem:[#allocation2 + $0x38] sm:$0xff] %vm65_vm1, %v60_v27 }
  0x90   :  { %68 = vst.msk [vmem:[#allocation2 + $0x20] sm:$0xff] %vm65_vm1, %v58_v28  ;;  %338 = vst.msk [vmem:[#allocation2 + $0x28] sm:$0xff] %vm65_vm1, %v58_v28  ;;  %329 = vperm.xlu1 %561, %v655_v3   ;;  %571 = vset.pattern.permute.xlu0 %v621_v29 }
  0x91   :  { %437 = vperm.xlu0 %571, %v649_v2  }
  0x92   :  { %v76_v30 = vpop.permute.xlu1 %75  ;;  %v72_v31 = vpop.permute.xlu0 %71 }
  0x93   :  { %87 = vst.msk [vmem:[#allocation2 + $0x50] sm:$0xff] %vm65_vm1, %v76_v30  ;;  %86 = vst.msk [vmem:[#allocation2 + $0x40] sm:$0xff] %vm65_vm1, %v72_v31 }
  0x94   :  { %564 = vset.pattern.permute.xlu1 %v617_v17 }
  0x95   :  { %345 = vperm.xlu1 %564, %v671_v6   ;;  %449 = vperm.xlu0 %571, %v655_v3  }
  0x96   :  { %v80_v32 = vpop.permute.xlu1 %79  ;;  %v84_v33 = vpop.permute.xlu0 %83 }
  0x97   :  { %88 = vst.msk [vmem:[#allocation2 + $0x60] sm:$0xff] %vm65_vm1, %v80_v32  ;;  %89 = vst.msk [vmem:[#allocation2 + $0x70] sm:$0xff] %vm65_vm1, %v84_v33 }
  0x99   :  { %349 = vperm.xlu1 %564, %v644_v0   ;;  %574 = vset.pattern.permute.xlu0 %v622_v34 }
  0x9a   :  { %v91_v35 = vpop.permute.xlu1 %90  ;;  %v93_v36 = vpop.permute.xlu0 %92  ;;  %465 = vperm.xlu0 %574, %v671_v6  }
  0x9b   :  { %103 = vst.msk [vmem:[#allocation2] sm:$0xff] %vm102_vm2, %v91_v35  ;;  %360 = vst.msk [vmem:[#allocation2 + $0x8] sm:$0xff] %vm102_vm2, %v91_v35 }
  0x9c   :  { %104 = vst.msk [vmem:[#allocation2 + $0x10] sm:$0xff] %vm102_vm2, %v93_v36  ;;  %361 = vst.msk [vmem:[#allocation2 + $0x18] sm:$0xff] %vm102_vm2, %v93_v36 }
  0x9d   :  { %565 = vset.pattern.permute.xlu1 %v618_v18 }
  0x9e   :  { %365 = vperm.xlu1 %565, %v649_v2   ;;  %v95_v37 = vpop.permute.xlu1 %94  ;;  %v97_v38 = vpop.permute.xlu0 %96  ;;  %575 = vset.pattern.permute.xlu0 %v623_v39 }
  0x9f   :  { %105 = vst.msk [vmem:[#allocation2 + $0x20] sm:$0xff] %vm102_vm2, %v95_v37  ;;  %362 = vst.msk [vmem:[#allocation2 + $0x28] sm:$0xff] %vm102_vm2, %v95_v37  ;;  %485 = vperm.xlu0 %575, %v649_v2  }
  0xa0   :  { %106 = vst.msk [vmem:[#allocation2 + $0x30] sm:$0xff] %vm102_vm2, %v97_v38  ;;  %363 = vst.msk [vmem:[#allocation2 + $0x38] sm:$0xff] %vm102_vm2, %v97_v38 }
  0xa2   :  { %373 = vperm.xlu1 %565, %v644_v0   ;;  %v109_v40 = vpop.permute.xlu1 %108  ;;  %v113_v41 = vpop.permute.xlu0 %112 }
  0xa3   :  { %123 = vst.msk [vmem:[#allocation2 + $0x40] sm:$0xff] %vm102_vm2, %v109_v40  ;;  %124 = vst.msk [vmem:[#allocation2 + $0x50] sm:$0xff] %vm102_vm2, %v113_v41  ;;  %497 = vperm.xlu0 %575, %v655_v3  }
  0xa6   :  { %377 = vperm.xlu1 %565, %v655_v3   ;;  %v117_v42 = vpop.permute.xlu1 %116  ;;  %v128_v43 = vpop.permute.xlu0 %127 }
  0xa7   :  { %125 = vst.msk [vmem:[#allocation2 + $0x60] sm:$0xff] %vm102_vm2, %v117_v42 }
  0xa8   :  { %140 = vst.msk [vmem:[#allocation2] sm:$0xff] %vm139_vm3, %v128_v43  ;;  %384 = vst.msk [vmem:[#allocation2 + $0x8] sm:$0xff] %vm139_vm3, %v128_v43 }
  0xaa   :  { %568 = vset.pattern.permute.xlu1 %v619_v21  ;;  %v121_v44 = vpop.permute.xlu1 %120  ;;  %v132_v45 = vpop.permute.xlu0 %131 }
  0xab   :  { %126 = vst.msk [vmem:[#allocation2 + $0x70] sm:$0xff] %vm102_vm2, %v121_v44  ;;  %393 = vperm.xlu1 %568, %v671_v6  }
  0xac   :  { %142 = vst.msk [vmem:[#allocation2 + $0x20] sm:$0xff] %vm139_vm3, %v132_v45  ;;  %386 = vst.msk [vmem:[#allocation2 + $0x28] sm:$0xff] %vm139_vm3, %v132_v45 }
  0xae   :  { %v130_v46 = vpop.permute.xlu1 %129  ;;  %v146_v47 = vpop.permute.xlu0 %145 }
  0xaf   :  { %141 = vst.msk [vmem:[#allocation2 + $0x10] sm:$0xff] %vm139_vm3, %v130_v46  ;;  %385 = vst.msk [vmem:[#allocation2 + $0x18] sm:$0xff] %vm139_vm3, %v130_v46  ;;  %397 = vperm.xlu1 %568, %v644_v0  }
  0xb0   :  { %160 = vst.msk [vmem:[#allocation2 + $0x40] sm:$0xff] %vm139_vm3, %v146_v47 }
  0xb2   :  { %v134_v48 = vpop.permute.xlu1 %133  ;;  %v158_v49 = vpop.permute.xlu0 %157 }
  0xb3   :  { %143 = vst.msk [vmem:[#allocation2 + $0x30] sm:$0xff] %vm139_vm3, %v134_v48  ;;  %387 = vst.msk [vmem:[#allocation2 + $0x38] sm:$0xff] %vm139_vm3, %v134_v48  ;;  %569 = vset.pattern.permute.xlu1 %v620_v26 }
  0xb4   :  { %163 = vst.msk [vmem:[#allocation2 + $0x70] sm:$0xff] %vm139_vm3, %v158_v49  ;;  %413 = vperm.xlu1 %569, %v649_v2  }
  0xb6   :  { %v150_v50 = vpop.permute.xlu1 %149  ;;  %v167_v51 = vpop.permute.xlu0 %166 }
  0xb7   :  { %161 = vst.msk [vmem:[#allocation2 + $0x50] sm:$0xff] %vm139_vm3, %v150_v50 }
  0xb8   :  { %178 = vst.msk [vmem:[#allocation2 + $0x10] sm:$0xff] %vm176_vm4, %v167_v51  ;;  %409 = vst.msk [vmem:[#allocation2 + $0x18] sm:$0xff] %vm176_vm4, %v167_v51  ;;  %421 = vperm.xlu1 %569, %v644_v0  }
  0xba   :  { %v154_v52 = vpop.permute.xlu1 %153  ;;  %v171_v53 = vpop.permute.xlu0 %170 }
  0xbb   :  { %162 = vst.msk [vmem:[#allocation2 + $0x60] sm:$0xff] %vm139_vm3, %v154_v52 }
  0xbc   :  { %180 = vst.msk [vmem:[#allocation2 + $0x30] sm:$0xff] %vm176_vm4, %v171_v53  ;;  %411 = vst.msk [vmem:[#allocation2 + $0x38] sm:$0xff] %vm176_vm4, %v171_v53  ;;  %425 = vperm.xlu1 %569, %v655_v3  }
  0xbe   :  { %v165_v54 = vpop.permute.xlu1 %164  ;;  %v187_v55 = vpop.permute.xlu0 %186 }
  0xbf   :  { %177 = vst.msk [vmem:[#allocation2] sm:$0xff] %vm176_vm4, %v165_v54  ;;  %408 = vst.msk [vmem:[#allocation2 + $0x8] sm:$0xff] %vm176_vm4, %v165_v54 }
  0xc0   :  { %198 = vst.msk [vmem:[#allocation2 + $0x50] sm:$0xff] %vm176_vm4, %v187_v55  ;;  %572 = vset.pattern.permute.xlu1 %v621_v29 }
  0xc1   :  { %441 = vperm.xlu1 %572, %v671_v6  }
  0xc2   :  { %v169_v56 = vpop.permute.xlu1 %168  ;;  %v202_v57 = vpop.permute.xlu0 %201 }
  0xc3   :  { %179 = vst.msk [vmem:[#allocation2 + $0x20] sm:$0xff] %vm176_vm4, %v169_v56  ;;  %410 = vst.msk [vmem:[#allocation2 + $0x28] sm:$0xff] %vm176_vm4, %v169_v56 }
  0xc4   :  { %214 = vst.msk [vmem:[#allocation2] sm:$0xff] %vm213_vm5, %v202_v57  ;;  %432 = vst.msk [vmem:[#allocation2 + $0x8] sm:$0xff] %vm213_vm5, %v202_v57 }
  0xc5   :  { %445 = vperm.xlu1 %572, %v644_v0  }
  0xc6   :  { %v183_v58 = vpop.permute.xlu1 %182  ;;  %v206_v59 = vpop.permute.xlu0 %205 }
  0xc7   :  { %197 = vst.msk [vmem:[#allocation2 + $0x40] sm:$0xff] %vm176_vm4, %v183_v58 }
  0xc8   :  { %216 = vst.msk [vmem:[#allocation2 + $0x20] sm:$0xff] %vm213_vm5, %v206_v59  ;;  %434 = vst.msk [vmem:[#allocation2 + $0x28] sm:$0xff] %vm213_vm5, %v206_v59 }
  0xc9   :  { %573 = vset.pattern.permute.xlu1 %v622_v34 }
  0xca   :  { %461 = vperm.xlu1 %573, %v649_v2   ;;  %v191_v60 = vpop.permute.xlu1 %190  ;;  %v220_v61 = vpop.permute.xlu0 %219 }
  0xcb   :  { %199 = vst.msk [vmem:[#allocation2 + $0x60] sm:$0xff] %vm176_vm4, %v191_v60 }
  0xcc   :  { %234 = vst.msk [vmem:[#allocation2 + $0x40] sm:$0xff] %vm213_vm5, %v220_v61 }
  0xce   :  { %469 = vperm.xlu1 %573, %v644_v0   ;;  %v195_v62 = vpop.permute.xlu1 %194  ;;  %v232_v63 = vpop.permute.xlu0 %231 }
  0xcf   :  { %200 = vst.msk [vmem:[#allocation2 + $0x70] sm:$0xff] %vm176_vm4, %v195_v62 }
  0xd0   :  { %237 = vst.msk [vmem:[#allocation2 + $0x70] sm:$0xff] %vm213_vm5, %v232_v63 }
  0xd2   :  { %473 = vperm.xlu1 %573, %v655_v3   ;;  %v204_v1 = vpop.permute.xlu1 %203  ;;  %v241_v4 = vpop.permute.xlu0 %240 }
  0xd3   :  { %215 = vst.msk [vmem:[#allocation2 + $0x10] sm:$0xff] %vm213_vm5, %v204_v1  ;;  %433 = vst.msk [vmem:[#allocation2 + $0x18] sm:$0xff] %vm213_vm5, %v204_v1 }
  0xd4   :  { %252 = vst.msk [vmem:[#allocation2 + $0x10] sm:$0xff] %vm250_vm6, %v241_v4  ;;  %457 = vst.msk [vmem:[#allocation2 + $0x18] sm:$0xff] %vm250_vm6, %v241_v4 }
  0xd6   :  { %576 = vset.pattern.permute.xlu1 %v623_v39  ;;  %v208_v2 = vpop.permute.xlu1 %207  ;;  %v245_v5 = vpop.permute.xlu0 %244 }
  0xd7   :  { %217 = vst.msk [vmem:[#allocation2 + $0x30] sm:$0xff] %vm213_vm5, %v208_v2  ;;  %435 = vst.msk [vmem:[#allocation2 + $0x38] sm:$0xff] %vm213_vm5, %v208_v2  ;;  %489 = vperm.xlu1 %576, %v671_v6  }
  0xd8   :  { %254 = vst.msk [vmem:[#allocation2 + $0x30] sm:$0xff] %vm250_vm6, %v245_v5  ;;  %459 = vst.msk [vmem:[#allocation2 + $0x38] sm:$0xff] %vm250_vm6, %v245_v5 }
  0xda   :  { %v224_v3 = vpop.permute.xlu1 %223  ;;  %v261_v7 = vpop.permute.xlu0 %260 }
  0xdb   :  { %235 = vst.msk [vmem:[#allocation2 + $0x50] sm:$0xff] %vm213_vm5, %v224_v3  ;;  %493 = vperm.xlu1 %576, %v644_v0  }
  0xdc   :  { %272 = vst.msk [vmem:[#allocation2 + $0x50] sm:$0xff] %vm250_vm6, %v261_v7 }
  0xde   :  { %v228_v8 = vpop.permute.xlu1 %227  ;;  %v276_v9 = vpop.permute.xlu0 %275 }
  0xdf   :  { %236 = vst.msk [vmem:[#allocation2 + $0x60] sm:$0xff] %vm213_vm5, %v228_v8 }
  0xe2   :  { %v239_v10 = vpop.permute.xlu1 %238  ;;  %v280_v11 = vpop.permute.xlu0 %279 }
  0xe3   :  { %251 = vst.msk [vmem:[#allocation2] sm:$0xff] %vm250_vm6, %v239_v10  ;;  %456 = vst.msk [vmem:[#allocation2 + $0x8] sm:$0xff] %vm250_vm6, %v239_v10 }
  0xe4   :  { %288 = vst.msk [vmem:[#allocation2] sm:$0xff] %vm287_vm7, %v276_v9  ;;  %480 = vst.msk [vmem:[#allocation2 + $0x8] sm:$0xff] %vm287_vm7, %v276_v9 }
  0xe6   :  { %v243_v6 = vpop.permute.xlu1 %242  ;;  %v294_v12 = vpop.permute.xlu0 %293 }
  0xe7   :  { %253 = vst.msk [vmem:[#allocation2 + $0x20] sm:$0xff] %vm250_vm6, %v243_v6  ;;  %458 = vst.msk [vmem:[#allocation2 + $0x28] sm:$0xff] %vm250_vm6, %v243_v6 }
  0xe8   :  { %290 = vst.msk [vmem:[#allocation2 + $0x20] sm:$0xff] %vm287_vm7, %v280_v11  ;;  %482 = vst.msk [vmem:[#allocation2 + $0x28] sm:$0xff] %vm287_vm7, %v280_v11 }
  0xea   :  { %v257_v0 = vpop.permute.xlu1 %256  ;;  %v306_v13 = vpop.permute.xlu0 %305 }
  0xeb   :  { %271 = vst.msk [vmem:[#allocation2 + $0x40] sm:$0xff] %vm250_vm6, %v257_v0 }
  0xec   :  { %308 = vst.msk [vmem:[#allocation2 + $0x40] sm:$0xff] %vm287_vm7, %v294_v12 }
  0xee   :  { %v265_v14 = vpop.permute.xlu1 %264 }
  0xef   :  { %273 = vst.msk [vmem:[#allocation2 + $0x60] sm:$0xff] %vm250_vm6, %v265_v14  ;;  %v322_v15 = vpop.permute.xlu0 %321 }
  0xf0   :  { %333 = vst.msk [vmem:[#allocation2 + $0x58] sm:$0xff] %vm20_vm0, %v322_v15 }
  0xf2   :  { %v269_v16 = vpop.permute.xlu1 %268 }
  0xf3   :  { %274 = vst.msk [vmem:[#allocation2 + $0x70] sm:$0xff] %vm250_vm6, %v269_v16 }
  0xf4   :  { %311 = vst.msk [vmem:[#allocation2 + $0x70] sm:$0xff] %vm287_vm7, %v306_v13  ;;  %v342_v21 = vpop.permute.xlu0 %341 }
  0xf6   :  { %v278_v17 = vpop.permute.xlu1 %277 }
  0xf7   :  { %289 = vst.msk [vmem:[#allocation2 + $0x10] sm:$0xff] %vm287_vm7, %v278_v17  ;;  %481 = vst.msk [vmem:[#allocation2 + $0x18] sm:$0xff] %vm287_vm7, %v278_v17 }
  0xf8   :  { %v354_v24 = vpop.permute.xlu0 %353 }
  0xfa   :  { %v282_v18 = vpop.permute.xlu1 %281 }
  0xfb   :  { %291 = vst.msk [vmem:[#allocation2 + $0x30] sm:$0xff] %vm287_vm7, %v282_v18  ;;  %483 = vst.msk [vmem:[#allocation2 + $0x38] sm:$0xff] %vm287_vm7, %v282_v18 }
  0xfd   :  { %v370_v26 = vpop.permute.xlu0 %369 }
  0xfe   :  { %v298_v19 = vpop.permute.xlu1 %297 }
  0xff   :  { %309 = vst.msk [vmem:[#allocation2 + $0x50] sm:$0xff] %vm287_vm7, %v298_v19 }
 0x102   :  { %v302_v20 = vpop.permute.xlu1 %301  ;;  %v390_v29 = vpop.permute.xlu0 %389 }
 0x103   :  { %310 = vst.msk [vmem:[#allocation2 + $0x60] sm:$0xff] %vm287_vm7, %v302_v20 }
 0x106   :  { %v402_v32 = vpop.permute.xlu0 %401 }
 0x107   :  { %v318_v22 = vpop.permute.xlu1 %317 }
 0x108   :  { %332 = vst.msk [vmem:[#allocation2 + $0x48] sm:$0xff] %vm20_vm0, %v318_v22 }
 0x109   :  { %356 = vst.msk [vmem:[#allocation2 + $0x48] sm:$0xff] %vm65_vm1, %v342_v21 }
 0x10b   :  { %v326_v23 = vpop.permute.xlu1 %325  ;;  %v418_v34 = vpop.permute.xlu0 %417 }
 0x10c   :  { %334 = vst.msk [vmem:[#allocation2 + $0x68] sm:$0xff] %vm20_vm0, %v326_v23 }
 0x10f   :  { %v330_v25 = vpop.permute.xlu1 %329 }
 0x110   :  { %335 = vst.msk [vmem:[#allocation2 + $0x78] sm:$0xff] %vm20_vm0, %v330_v25  ;;  %v438_v38 = vpop.permute.xlu0 %437 }
 0x111   :  { %359 = vst.msk [vmem:[#allocation2 + $0x78] sm:$0xff] %vm65_vm1, %v354_v24 }
 0x114   :  { %v346_v27 = vpop.permute.xlu1 %345  ;;  %v450_v40 = vpop.permute.xlu0 %449 }
 0x115   :  { %357 = vst.msk [vmem:[#allocation2 + $0x58] sm:$0xff] %vm65_vm1, %v346_v27 }
 0x116   :  { %381 = vst.msk [vmem:[#allocation2 + $0x58] sm:$0xff] %vm102_vm2, %v370_v26 }
 0x118   :  { %v350_v28 = vpop.permute.xlu1 %349 }
 0x119   :  { %358 = vst.msk [vmem:[#allocation2 + $0x68] sm:$0xff] %vm65_vm1, %v350_v28  ;;  %v466_v43 = vpop.permute.xlu0 %465 }
 0x11d   :  { %v366_v30 = vpop.permute.xlu1 %365 }
 0x11e   :  { %380 = vst.msk [vmem:[#allocation2 + $0x48] sm:$0xff] %vm102_vm2, %v366_v30  ;;  %v486_v46 = vpop.permute.xlu0 %485 }
 0x11f   :  { %404 = vst.msk [vmem:[#allocation2 + $0x48] sm:$0xff] %vm139_vm3, %v390_v29 }
 0x121   :  { %v374_v31 = vpop.permute.xlu1 %373 }
 0x122   :  { %382 = vst.msk [vmem:[#allocation2 + $0x68] sm:$0xff] %vm102_vm2, %v374_v31  ;;  %v498_v48 = vpop.permute.xlu0 %497 }
 0x125   :  { %v378_v33 = vpop.permute.xlu1 %377 }
 0x126   :  { %383 = vst.msk [vmem:[#allocation2 + $0x78] sm:$0xff] %vm102_vm2, %v378_v33 }
 0x127   :  { %407 = vst.msk [vmem:[#allocation2 + $0x78] sm:$0xff] %vm139_vm3, %v402_v32 }
 0x12a   :  { %v394_v35 = vpop.permute.xlu1 %393 }
 0x12b   :  { %405 = vst.msk [vmem:[#allocation2 + $0x58] sm:$0xff] %vm139_vm3, %v394_v35 }
 0x12c   :  { %429 = vst.msk [vmem:[#allocation2 + $0x58] sm:$0xff] %vm176_vm4, %v418_v34 }
 0x12e   :  { %v398_v36 = vpop.permute.xlu1 %397 }
 0x12f   :  { %406 = vst.msk [vmem:[#allocation2 + $0x68] sm:$0xff] %vm139_vm3, %v398_v36 }
 0x133   :  { %v414_v37 = vpop.permute.xlu1 %413 }
 0x134   :  { %428 = vst.msk [vmem:[#allocation2 + $0x48] sm:$0xff] %vm176_vm4, %v414_v37 }
 0x135   :  { %452 = vst.msk [vmem:[#allocation2 + $0x48] sm:$0xff] %vm213_vm5, %v438_v38 }
 0x137   :  { %v422_v39 = vpop.permute.xlu1 %421 }
 0x138   :  { %430 = vst.msk [vmem:[#allocation2 + $0x68] sm:$0xff] %vm176_vm4, %v422_v39 }
 0x13b   :  { %v426_v41 = vpop.permute.xlu1 %425 }
 0x13c   :  { %431 = vst.msk [vmem:[#allocation2 + $0x78] sm:$0xff] %vm176_vm4, %v426_v41 }
 0x13d   :  { %455 = vst.msk [vmem:[#allocation2 + $0x78] sm:$0xff] %vm213_vm5, %v450_v40 }
 0x140   :  { %v442_v42 = vpop.permute.xlu1 %441 }
 0x141   :  { %453 = vst.msk [vmem:[#allocation2 + $0x58] sm:$0xff] %vm213_vm5, %v442_v42 }
 0x142   :  { %477 = vst.msk [vmem:[#allocation2 + $0x58] sm:$0xff] %vm250_vm6, %v466_v43 }
 0x144   :  { %v446_v44 = vpop.permute.xlu1 %445 }
 0x145   :  { %454 = vst.msk [vmem:[#allocation2 + $0x68] sm:$0xff] %vm213_vm5, %v446_v44 }
 0x149   :  { %v462_v45 = vpop.permute.xlu1 %461 }
 0x14a   :  { %476 = vst.msk [vmem:[#allocation2 + $0x48] sm:$0xff] %vm250_vm6, %v462_v45 }
 0x14b   :  { %500 = vst.msk [vmem:[#allocation2 + $0x48] sm:$0xff] %vm287_vm7, %v486_v46 }
 0x14d   :  { %v470_v47 = vpop.permute.xlu1 %469 }
 0x14e   :  { %478 = vst.msk [vmem:[#allocation2 + $0x68] sm:$0xff] %vm250_vm6, %v470_v47 }
 0x151   :  { %v474_v49 = vpop.permute.xlu1 %473 }
 0x152   :  { %479 = vst.msk [vmem:[#allocation2 + $0x78] sm:$0xff] %vm250_vm6, %v474_v49 }
 0x153   :  { %503 = vst.msk [vmem:[#allocation2 + $0x78] sm:$0xff] %vm287_vm7, %v498_v48 }
 0x156   :  { %v490_v50 = vpop.permute.xlu1 %489 }
 0x157   :  { %501 = vst.msk [vmem:[#allocation2 + $0x58] sm:$0xff] %vm287_vm7, %v490_v50 }
 0x15a   :  { %v494_v51 = vpop.permute.xlu1 %493 }
 0x15b   :  { %502 = vst.msk [vmem:[#allocation2 + $0x68] sm:$0xff] %vm287_vm7, %v494_v51 }
 0x15c   :  { %588 = shalt.err (!%p585_p4)
}
 0x15d   :  { %s589_s7 = scalar_lea.hbm %s938_s2, 2048 }
 0x15e   :  { %p590_p5 = scmp.ne.s32.totalorder %s938_s2, %s589_s7  ;;  %p593_p6 = scmp.lt.u32.totalorder %s589_s7, %s938_s2 }
 0x160   :  { %p595_p7 = pnand %p593_p6, %p590_p5 }
 0x162   :  { %598 = shalt.err (!%p595_p7)
}
 0x163   :  { %s625_s12 = smov 256  }
 0x164   :  { %515 = dma.vmem_to_hbm [thread:$0]  %s510_s3, 2048, %s938_s2, [#allocation3], %s625_s12, %s625_s12, %s602_s0  }
 0x165   :  { %599 = dma.done.wait [#allocation3], 2048  }
 0x166   :  { %600 = vsyncadd [#allocation3], 4294965248 }
 0x167   :  { %519 = vsyncpa [#allocation3], 1 }

</bundles_post_ra>
